<compile_context>
chip_gen: v7x
topology: tpu7x:2x2x1
jax: 0.10.0
libtpu: 0.0.40
codegen_flags: <defaults>
</compile_context>

<pallas_src>
import jax
import jax.numpy as jnp
from jax.experimental import pallas as pl
from jax.experimental.pallas import tpu as pltpu

_LANE = 128
_SUBLANE = 8


def _round_up(n: int, m: int) -> int:
    return ((n + m - 1) // m) * m


def _vmem_capacity_bytes() -> int:
    """Physical per-core VMEM, with a conservative fallback (v7x = 64 MiB)."""
    try:
        return int(pltpu.get_tpu_info().vmem_capacity_bytes)
    except Exception:
        return 64 << 20


# ---------------------------------------------------------------------------
# Kernels
# ---------------------------------------------------------------------------

def _fc_res_kernel(x_ref, w1t_ref, b1_ref, w2t_ref, b2_ref, o_ref):
    """Resident-weights path: both (D, D) weights live in VMEM, grid = (batch,)."""
    h = jnp.dot(x_ref[...].astype(w1t_ref.dtype), w1t_ref[...],
                preferred_element_type=jnp.float32)
    h = jnp.maximum(h + b1_ref[...], 0.0)          # (1, D) bias broadcasts
    y = jnp.dot(h.astype(w2t_ref.dtype), w2t_ref[...],
                preferred_element_type=jnp.float32)
    y = jnp.maximum(y + b2_ref[...], 0.0)
    # Residual read at store time: no (tb, D) f32 copy of x kept live across
    # both matmuls (x is already resident in VMEM).
    o_ref[...] = (x_ref[...].astype(jnp.float32) + y).astype(o_ref.dtype)


def _fc_res_kernel_ktiled(x_ref, w1t_ref, b1_ref, w2t_ref, b2_ref, o_ref,
                          acc_ref):
    """Hidden-dim-tiled path for large D: grid = (batch, hidden)."""
    k = pl.program_id(1)

    @pl.when(k == 0)
    def _():
        acc_ref[...] = jnp.zeros_like(acc_ref)

    # ReLU is per-hidden-unit, so it can be applied per hidden slab exactly.
    h = jnp.dot(x_ref[...].astype(w1t_ref.dtype), w1t_ref[...],
                preferred_element_type=jnp.float32)
    h = jnp.maximum(h + b1_ref[...], 0.0)
    acc_ref[...] += jnp.dot(h.astype(w2t_ref.dtype), w2t_ref[...],
                            preferred_element_type=jnp.float32)

    @pl.when(k == pl.num_programs(1) - 1)
    def _():
        y = jnp.maximum(acc_ref[...] + b2_ref[...], 0.0)
        o_ref[...] = (x_ref[...].astype(jnp.float32) + y).astype(o_ref.dtype)


# ---------------------------------------------------------------------------
# Tiling plan
# ---------------------------------------------------------------------------

def _plan_tiles(B, D, x_itemsize, w_itemsize, tb=None, hidden_tile=None):
    vmem_cap = _vmem_capacity_bytes()
    vmem_budget = (vmem_cap * 3) // 4            # leave compiler headroom

    # ---- hidden-dim tile (weight residency) ----
    if hidden_tile is None:
        if 2 * D * D * w_itemsize <= vmem_budget // 2:
            hidden_tile = D                      # both weights fully resident
        else:
            hidden_tile = _LANE
            t = 2 * _LANE
            while t < D:
                # streamed weight slabs get double-buffered by the pipeline
                if D % t == 0 and 2 * (2 * D * t * w_itemsize) <= vmem_budget // 2:
                    hidden_tile = t
                t += _LANE
    assert hidden_tile % _LANE == 0 and D % hidden_tile == 0, \
        "hidden_tile must be a multiple of 128 that divides D"
    tiled = hidden_tile < D
    w_bytes = 2 * D * hidden_tile * w_itemsize * (2 if tiled else 1)

    # ---- batch tile ----
    Bp8 = _round_up(max(B, 1), _SUBLANE)
    if tb is None:
        # ~3 MiB of f32 activations per tile: amortizes per-grid-step overhead
        # and keeps the x/out DMAs in HBM-roofline territory.
        tb = max(256, min(4096, _round_up((3 << 20) // (4 * D), _SUBLANE)))
    # Per-row VMEM next to the weights: double-buffered x and out tiles plus
    # the f32 h/y temporaries (+ the f32 accumulator on the tiled path).
    per_row = D * (4 * x_itemsize + 8 + (4 if tiled else 0))
    tb_cap = ((vmem_budget - w_bytes) // max(per_row, 1)) // _SUBLANE * _SUBLANE
    tb = max(_SUBLANE, min(tb, max(_SUBLANE, tb_cap)))
    # >=2 batch steps when the batch allows: shards across v7x's two
    # TensorCores and gives the software pipeline something to overlap.
    min_steps = 2 if Bp8 >= 2 * _SUBLANE else 1
    n_b = max(pl.cdiv(Bp8, tb), min_steps)
    tb = _round_up(pl.cdiv(Bp8, n_b), _SUBLANE)
    Bp = n_b * tb

    est = w_bytes + 4 * D * 4 * 2 + per_row * tb + (2 << 20)
    vmem_limit = int(min(vmem_cap, max(2 * est, 32 << 20)))
    return tb, Bp, hidden_tile, vmem_limit


# ---------------------------------------------------------------------------
# pallas_call builders
# ---------------------------------------------------------------------------

def _call_resident(x_in, w1t, b1r, w2t, b2r, *, tb, vmem_limit,
                   single_buffer_weights):
    Bp, D = x_in.shape

    def _const_spec(shape):
        # Weights/biases never change across the grid; single-buffer them so
        # resident VMEM is 1x instead of 2x (matters at D >= 2048).
        if single_buffer_weights:
            return pl.BlockSpec(shape, lambda i: (0, 0),
                                pipeline_mode=pl.Buffered(1))
        return pl.BlockSpec(shape, lambda i: (0, 0))

    return pl.pallas_call(
        _fc_res_kernel,
        out_shape=jax.ShapeDtypeStruct((Bp, D), x_in.dtype),
        grid_spec=pltpu.PrefetchScalarGridSpec(
            num_scalar_prefetch=0,
            grid=(Bp // tb,),
            in_specs=[
                pl.BlockSpec((tb, D), lambda i: (i, 0)),   # x tile over batch
                _const_spec((D, D)),                       # W1^T (resident)
                _const_spec((1, D)),                       # b1
                _const_spec((D, D)),                       # W2^T (resident)
                _const_spec((1, D)),                       # b2
            ],
            out_specs=pl.BlockSpec((tb, D), lambda i: (i, 0)),
        ),
        compiler_params=pltpu.CompilerParams(
            dimension_semantics=("parallel",),
            vmem_limit_bytes=vmem_limit),
    )(x_in, w1t, b1r, w2t, b2r)


def _call_ktiled(x_in, w1t, b1r, w2t, b2r, *, tb, tk, vmem_limit):
    Bp, D = x_in.shape
    return pl.pallas_call(
        _fc_res_kernel_ktiled,
        out_shape=jax.ShapeDtypeStruct((Bp, D), x_in.dtype),
        grid_spec=pltpu.PrefetchScalarGridSpec(
            num_scalar_prefetch=0,
            grid=(Bp // tb, D // tk),
            in_specs=[
                pl.BlockSpec((tb, D), lambda i, k: (i, 0)),  # x (const over k)
                pl.BlockSpec((D, tk), lambda i, k: (0, k)),  # W1^T hidden slab
                pl.BlockSpec((1, tk), lambda i, k: (0, k)),  # b1 slab
                pl.BlockSpec((tk, D), lambda i, k: (k, 0)),  # W2^T hidden slab
                pl.BlockSpec((1, D), lambda i, k: (0, 0)),   # b2
            ],
            out_specs=pl.BlockSpec((tb, D), lambda i, k: (i, 0)),
            scratch_shapes=[pltpu.VMEM((tb, D), jnp.float32)],
        ),
        compiler_params=pltpu.CompilerParams(
            dimension_semantics=("parallel", "arbitrary"),
            vmem_limit_bytes=vmem_limit),
    )(x_in, w1t, b1r, w2t, b2r)


# ---------------------------------------------------------------------------
# Public API
# ---------------------------------------------------------------------------

def prepare_fc_res_params(w1, b1, w2, b2, *, mxu_dtype=jnp.bfloat16):
    """One-time parameter prep (do this at load time, not per call).

    w1, w2: (out, in) PyTorch nn.Linear convention. Returns transposed
    (in, out) weights in the MXU dtype and (1, D) f32 biases.
    """
    w1t = jnp.asarray(w1).T.astype(mxu_dtype)
    w2t = jnp.asarray(w2).T.astype(mxu_dtype)
    b1r = jnp.asarray(b1, dtype=jnp.float32).reshape(1, -1)
    b2r = jnp.asarray(b2, dtype=jnp.float32).reshape(1, -1)
    return w1t, b1r, w2t, b2r


def fc_res_layer(x, w1t, b1r, w2t, b2r, *, tb=None, hidden_tile=None):
    """Fused FCResLayer forward.

    x: (B, D), f32 or bf16 (residual add / accumulation always f32).
    w1t, w2t: (D, D) already transposed to (in, out), in the MXU dtype.
    b1r, b2r: (1, D) f32. D must be a multiple of 128 (lane-dense); B may be
    ragged (padded internally by at most a few rows per grid step).
    """
    B, D = x.shape
    assert D % _LANE == 0, "linear_size must be a multiple of 128 (lane width)"
    # TODO(synk): for non-multiple-of-128 linear_size, pad D and mask instead.
    assert w1t.shape == (D, D) and w2t.shape == (D, D)
    assert b1r.shape == (1, D) and b2r.shape == (1, D)

    tb_eff, Bp, tk, vmem_limit = _plan_tiles(
        B, D, x.dtype.itemsize, w1t.dtype.itemsize, tb=tb,
        hidden_tile=hidden_tile)

    # Pad only up to the (nearly dividing) tile; at most ~8 rows per grid step.
    # TODO(synk): mask the ragged tail in-kernel to avoid jnp.pad's extra HBM
    # copy of x when B is not already a multiple of the tile.
    x_in = x if Bp == B else jnp.pad(x, ((0, Bp - B), (0, 0)))

    if tk == D:
        try:
            out = _call_resident(x_in, w1t, b1r, w2t, b2r, tb=tb_eff,
                                 vmem_limit=vmem_limit,
                                 single_buffer_weights=True)
        except Exception:
            # JAX without BlockSpec(pipeline_mode=...): fall back to the
            # default double-buffered resident weights.
            out = _call_resident(x_in, w1t, b1r, w2t, b2r, tb=tb_eff,
                                 vmem_limit=vmem_limit,
                                 single_buffer_weights=False)
    else:
        out = _call_ktiled(x_in, w1t, b1r, w2t, b2r, tb=tb_eff, tk=tk,
                           vmem_limit=vmem_limit)

    return out if Bp == B else out[:B]


def fc_res_layer_ref(x, w1, b1, w2, b2):
    """Pure-JAX reference matching the PyTorch forward."""
    y = jnp.maximum(x @ w1.T + b1, 0.0)
    y = jnp.maximum(y @ w2.T + b2, 0.0)
    return x + y


if __name__ == "__main__":
    keys = jax.random.split(jax.random.PRNGKey(0), 12)

    # ---- FCResLayer default: linear_size = 128 ----
    D, B = 128, 8
    bound = 1.0 / (D ** 0.5)
    x = jax.random.normal(keys[0], (B, D), dtype=jnp.float32)
    w1 = jax.random.uniform(keys[1], (D, D), minval=-bound, maxval=bound,
                            dtype=jnp.float32)
    b1 = jax.random.uniform(keys[2], (D,), minval=-bound, maxval=bound,
                            dtype=jnp.float32)
    w2 = jax.random.uniform(keys[3], (D, D), minval=-bound, maxval=bound,
                            dtype=jnp.float32)
    b2 = jax.random.uniform(keys[4], (D,), minval=-bound, maxval=bound,
                            dtype=jnp.float32)
    ref = fc_res_layer_ref(x, w1, b1, w2, b2)

    # 1) Main path: bf16 weights+activations into the MXU, f32 accumulation,
    #    f32 residual/output. Resident-weight kernel, grid over batch.
    p_bf16 = prepare_fc_res_params(w1, b1, w2, b2, mxu_dtype=jnp.bfloat16)
    out = jax.block_until_ready(fc_res_layer(x, *p_bf16))
    assert out.shape == (B, D) and out.dtype == x.dtype
    assert jnp.allclose(out, ref, atol=3e-2, rtol=3e-2)

    # 2) f32 weights, ragged batch: exercises the pad/slice path and the
    #    >=2-step batch grid. Tolerance covers reduced-precision MXU passes at
    #    default matmul precision (both in the kernel and in the reference).
    Br = 13
    xr = jax.random.normal(keys[5], (Br, D), dtype=jnp.float32)
    p_f32 = prepare_fc_res_params(w1, b1, w2, b2, mxu_dtype=jnp.float32)
    out_r = jax.block_until_ready(fc_res_layer(xr, *p_f32))
    ref_r = fc_res_layer_ref(xr, w1, b1, w2, b2)
    assert out_r.shape == (Br, D) and out_r.dtype == xr.dtype
    assert jnp.allclose(out_r, ref_r, atol=2e-2, rtol=2e-2)

    # 3) Hidden-dim-tiled path (auto-selected when resident DxD weights would
    #    blow the VMEM budget at large D); forced here at a small shape so the
    #    accumulator kernel is exercised: D=256, tk=128, ragged batch.
    D2, B2 = 256, 40
    bound2 = 1.0 / (D2 ** 0.5)
    x2 = jax.random.normal(keys[6], (B2, D2), dtype=jnp.float32)
    w1_2 = jax.random.uniform(keys[7], (D2, D2), minval=-bound2, maxval=bound2,
                              dtype=jnp.float32)
    b1_2 = jax.random.uniform(keys[8], (D2,), minval=-bound2, maxval=bound2,
                              dtype=jnp.float32)
    w2_2 = jax.random.uniform(keys[9], (D2, D2), minval=-bound2, maxval=bound2,
                              dtype=jnp.float32)
    b2_2 = jax.random.uniform(keys[10], (D2,), minval=-bound2, maxval=bound2,
                              dtype=jnp.float32)
    p2 = prepare_fc_res_params(w1_2, b1_2, w2_2, b2_2, mxu_dtype=jnp.float32)
    out2 = jax.block_until_ready(fc_res_layer(x2, *p2, hidden_tile=128))
    ref2 = fc_res_layer_ref(x2, w1_2, b1_2, w2_2, b2_2)
    assert out2.shape == (B2, D2) and out2.dtype == x2.dtype
    assert jnp.allclose(out2, ref2, atol=2e-2, rtol=2e-2)

    print("KERNEL_OK")
</pallas_src>

<mosaic_0001>
module attributes {stable_mosaic.version = 11 : i64} {
  func.func @_fc_res_kernel(%arg0: i32, %arg1: memref<8x128xf32, #tpu.memory_space<vmem>>, %arg2: memref<128x128xbf16, #tpu.memory_space<vmem>>, %arg3: memref<1x128xf32, #tpu.memory_space<vmem>>, %arg4: memref<128x128xbf16, #tpu.memory_space<vmem>>, %arg5: memref<1x128xf32, #tpu.memory_space<vmem>>, %arg6: memref<8x128xf32, #tpu.memory_space<vmem>>) attributes {dimension_semantics = [#tpu.dimension_semantics<parallel>], iteration_bounds = array<i64: 1>, scalar_prefetch = 0 : i64, scratch_operands = 0 : i64, tpu.core_type = #tpu.core_type<tc>, window_params = [{transform_indices = @transform_0, window_bounds = array<i64: 8, 128>}, {pipeline_mode = #tpu.pipeline_mode<synchronous>, transform_indices = @transform_1, window_bounds = array<i64: 128, 128>}, {pipeline_mode = #tpu.pipeline_mode<synchronous>, transform_indices = @transform_2, window_bounds = array<i64: 1, 128>}, {pipeline_mode = #tpu.pipeline_mode<synchronous>, transform_indices = @transform_3, window_bounds = array<i64: 128, 128>}, {pipeline_mode = #tpu.pipeline_mode<synchronous>, transform_indices = @transform_4, window_bounds = array<i64: 1, 128>}, {transform_indices = @transform_5, window_bounds = array<i64: 8, 128>}]} {
    %c0 = arith.constant 0 : index
    %c0_0 = arith.constant 0 : index
    %0 = vector.load %arg1[%c0, %c0_0] : memref<8x128xf32, #tpu.memory_space<vmem>>, vector<8x128xf32>
    %1 = arith.truncf %0 : vector<8x128xf32> to vector<8x128xbf16>
    %c0_1 = arith.constant 0 : index
    %c0_2 = arith.constant 0 : index
    %2 = vector.load %arg2[%c0_1, %c0_2] : memref<128x128xbf16, #tpu.memory_space<vmem>>, vector<128x128xbf16>
    %cst = arith.constant dense<0.000000e+00> : vector<8x128xf32>
    %3 = tpu.matmul %1, %2, %cst {dimension_numbers = #tpu.dot_dimension_numbers<[1], [0], [0], [1], [0, 0, 1, 1], [], []>} : vector<8x128xbf16>, vector<128x128xbf16>, vector<8x128xf32> -> vector<8x128xf32>
    %c0_3 = arith.constant 0 : index
    %c0_4 = arith.constant 0 : index
    %4 = vector.load %arg3[%c0_3, %c0_4] : memref<1x128xf32, #tpu.memory_space<vmem>>, vector<1x128xf32>
    %5 = vector.broadcast %4 : vector<1x128xf32> to vector<8x128xf32>
    %6 = arith.addf %3, %5 : vector<8x128xf32>
    %cst_5 = arith.constant 0.000000e+00 : f32
    %7 = vector.broadcast %cst_5 : f32 to vector<8x128xf32>
    %8 = arith.maximumf %6, %7 : vector<8x128xf32>
    %9 = arith.truncf %8 : vector<8x128xf32> to vector<8x128xbf16>
    %c0_6 = arith.constant 0 : index
    %c0_7 = arith.constant 0 : index
    %10 = vector.load %arg4[%c0_6, %c0_7] : memref<128x128xbf16, #tpu.memory_space<vmem>>, vector<128x128xbf16>
    %cst_8 = arith.constant dense<0.000000e+00> : vector<8x128xf32>
    %11 = tpu.matmul %9, %10, %cst_8 {dimension_numbers = #tpu.dot_dimension_numbers<[1], [0], [0], [1], [0, 0, 1, 1], [], []>} : vector<8x128xbf16>, vector<128x128xbf16>, vector<8x128xf32> -> vector<8x128xf32>
    %c0_9 = arith.constant 0 : index
    %c0_10 = arith.constant 0 : index
    %12 = vector.load %arg5[%c0_9, %c0_10] : memref<1x128xf32, #tpu.memory_space<vmem>>, vector<1x128xf32>
    %13 = vector.broadcast %12 : vector<1x128xf32> to vector<8x128xf32>
    %14 = arith.addf %11, %13 : vector<8x128xf32>
    %cst_11 = arith.constant 0.000000e+00 : f32
    %15 = vector.broadcast %cst_11 : f32 to vector<8x128xf32>
    %16 = arith.maximumf %14, %15 : vector<8x128xf32>
    %c0_12 = arith.constant 0 : index
    %c0_13 = arith.constant 0 : index
    %17 = vector.load %arg1[%c0_12, %c0_13] : memref<8x128xf32, #tpu.memory_space<vmem>>, vector<8x128xf32>
    %18 = arith.addf %17, %16 : vector<8x128xf32>
    %c0_14 = arith.constant 0 : index
    %c0_15 = arith.constant 0 : index
    %19 = vector.load %arg6[%c0_14, %c0_15] : memref<8x128xf32, #tpu.memory_space<vmem>>, vector<8x128xf32>
    tpu.vector_store %arg6[%c0_14, %c0_15], %18 {strides = array<i32>} : memref<8x128xf32, #tpu.memory_space<vmem>>, vector<8x128xf32>,
    return
  }
  func.func @transform_0(%arg0: i32) -> (i32, i32) {
    %c0_i32 = arith.constant 0 : i32
    %c0_i32_0 = arith.constant 0 : i32
    return %arg0, %c0_i32 : i32, i32
  }
  func.func @transform_1(%arg0: i32) -> (i32, i32) {
    %c0_i32 = arith.constant 0 : i32
    %c0_i32_0 = arith.constant 0 : i32
    %c0_i32_1 = arith.constant 0 : i32
    return %c0_i32, %c0_i32_0 : i32, i32
  }
  func.func @transform_2(%arg0: i32) -> (i32, i32) {
    %c0_i32 = arith.constant 0 : i32
    %c0_i32_0 = arith.constant 0 : i32
    %c0_i32_1 = arith.constant 0 : i32
    return %c0_i32, %c0_i32_0 : i32, i32
  }
  func.func @transform_3(%arg0: i32) -> (i32, i32) {
    %c0_i32 = arith.constant 0 : i32
    %c0_i32_0 = arith.constant 0 : i32
    %c0_i32_1 = arith.constant 0 : i32
    return %c0_i32, %c0_i32_0 : i32, i32
  }
  func.func @transform_4(%arg0: i32) -> (i32, i32) {
    %c0_i32 = arith.constant 0 : i32
    %c0_i32_0 = arith.constant 0 : i32
    %c0_i32_1 = arith.constant 0 : i32
    return %c0_i32, %c0_i32_0 : i32, i32
  }
  func.func @transform_5(%arg0: i32) -> (i32, i32) {
    %c0_i32 = arith.constant 0 : i32
    %c0_i32_0 = arith.constant 0 : i32
    return %arg0, %c0_i32 : i32, i32
  }
}

module attributes {stable_mosaic.version = 11 : i64} {
  func.func @_fc_res_kernel(%arg0: i32, %arg1: memref<8x128xf32, #tpu.memory_space<vmem>>, %arg2: memref<128x128xbf16, #tpu.memory_space<vmem>>, %arg3: memref<1x128xf32, #tpu.memory_space<vmem>>, %arg4: memref<128x128xbf16, #tpu.memory_space<vmem>>, %arg5: memref<1x128xf32, #tpu.memory_space<vmem>>, %arg6: memref<8x128xf32, #tpu.memory_space<vmem>>) attributes {dimension_semantics = [#tpu.dimension_semantics<parallel>], iteration_bounds = array<i64: 1>, scalar_prefetch = 0 : i64, scratch_operands = 0 : i64, tpu.core_type = #tpu.core_type<tc>, window_params = [{transform_indices = @transform_0, window_bounds = array<i64: 8, 128>}, {pipeline_mode = #tpu.pipeline_mode<synchronous>, transform_indices = @transform_1, window_bounds = array<i64: 128, 128>}, {pipeline_mode = #tpu.pipeline_mode<synchronous>, transform_indices = @transform_2, window_bounds = array<i64: 1, 128>}, {pipeline_mode = #tpu.pipeline_mode<synchronous>, transform_indices = @transform_3, window_bounds = array<i64: 128, 128>}, {pipeline_mode = #tpu.pipeline_mode<synchronous>, transform_indices = @transform_4, window_bounds = array<i64: 1, 128>}, {transform_indices = @transform_5, window_bounds = array<i64: 8, 128>}]} {
    %c0 = arith.constant 0 : index
    %c0_0 = arith.constant 0 : index
    %0 = vector.load %arg1[%c0, %c0_0] : memref<8x128xf32, #tpu.memory_space<vmem>>, vector<8x128xf32>
    %1 = arith.truncf %0 : vector<8x128xf32> to vector<8x128xbf16>
    %c0_1 = arith.constant 0 : index
    %c0_2 = arith.constant 0 : index
    %2 = vector.load %arg2[%c0_1, %c0_2] : memref<128x128xbf16, #tpu.memory_space<vmem>>, vector<128x128xbf16>
    %cst = arith.constant dense<0.000000e+00> : vector<8x128xf32>
    %3 = tpu.matmul %1, %2, %cst {dimension_numbers = #tpu.dot_dimension_numbers<[1], [0], [0], [1], [0, 0, 1, 1], [], []>} : vector<8x128xbf16>, vector<128x128xbf16>, vector<8x128xf32> -> vector<8x128xf32>
    %c0_3 = arith.constant 0 : index
    %c0_4 = arith.constant 0 : index
    %4 = vector.load %arg3[%c0_3, %c0_4] : memref<1x128xf32, #tpu.memory_space<vmem>>, vector<1x128xf32>
    %5 = vector.broadcast %4 : vector<1x128xf32> to vector<8x128xf32>
    %6 = arith.addf %3, %5 : vector<8x128xf32>
    %cst_5 = arith.constant 0.000000e+00 : f32
    %7 = vector.broadcast %cst_5 : f32 to vector<8x128xf32>
    %8 = arith.maximumf %6, %7 : vector<8x128xf32>
    %9 = arith.truncf %8 : vector<8x128xf32> to vector<8x128xbf16>
    %c0_6 = arith.constant 0 : index
    %c0_7 = arith.constant 0 : index
    %10 = vector.load %arg4[%c0_6, %c0_7] : memref<128x128xbf16, #tpu.memory_space<vmem>>, vector<128x128xbf16>
    %cst_8 = arith.constant dense<0.000000e+00> : vector<8x128xf32>
    %11 = tpu.matmul %9, %10, %cst_8 {dimension_numbers = #tpu.dot_dimension_numbers<[1], [0], [0], [1], [0, 0, 1, 1], [], []>} : vector<8x128xbf16>, vector<128x128xbf16>, vector<8x128xf32> -> vector<8x128xf32>
    %c0_9 = arith.constant 0 : index
    %c0_10 = arith.constant 0 : index
    %12 = vector.load %arg5[%c0_9, %c0_10] : memref<1x128xf32, #tpu.memory_space<vmem>>, vector<1x128xf32>
    %13 = vector.broadcast %12 : vector<1x128xf32> to vector<8x128xf32>
    %14 = arith.addf %11, %13 : vector<8x128xf32>
    %cst_11 = arith.constant 0.000000e+00 : f32
    %15 = vector.broadcast %cst_11 : f32 to vector<8x128xf32>
    %16 = arith.maximumf %14, %15 : vector<8x128xf32>
    %c0_12 = arith.constant 0 : index
    %c0_13 = arith.constant 0 : index
    %17 = vector.load %arg1[%c0_12, %c0_13] : memref<8x128xf32, #tpu.memory_space<vmem>>, vector<8x128xf32>
    %18 = arith.addf %17, %16 : vector<8x128xf32>
    %c0_14 = arith.constant 0 : index
    %c0_15 = arith.constant 0 : index
    %19 = vector.load %arg6[%c0_14, %c0_15] : memref<8x128xf32, #tpu.memory_space<vmem>>, vector<8x128xf32>
    tpu.vector_store %arg6[%c0_14, %c0_15], %18 {strides = array<i32>} : memref<8x128xf32, #tpu.memory_space<vmem>>, vector<8x128xf32>,
    return
  }
  func.func @transform_0(%arg0: i32) -> (i32, i32) {
    %c0_i32 = arith.constant 0 : i32
    %c0_i32_0 = arith.constant 0 : i32
    return %arg0, %c0_i32 : i32, i32
  }
  func.func @transform_1(%arg0: i32) -> (i32, i32) {
    %c0_i32 = arith.constant 0 : i32
    %c0_i32_0 = arith.constant 0 : i32
    %c0_i32_1 = arith.constant 0 : i32
    return %c0_i32, %c0_i32_0 : i32, i32
  }
  func.func @transform_2(%arg0: i32) -> (i32, i32) {
    %c0_i32 = arith.constant 0 : i32
    %c0_i32_0 = arith.constant 0 : i32
    %c0_i32_1 = arith.constant 0 : i32
    return %c0_i32, %c0_i32_0 : i32, i32
  }
  func.func @transform_3(%arg0: i32) -> (i32, i32) {
    %c0_i32 = arith.constant 0 : i32
    %c0_i32_0 = arith.constant 0 : i32
    %c0_i32_1 = arith.constant 0 : i32
    return %c0_i32, %c0_i32_0 : i32, i32
  }
  func.func @transform_4(%arg0: i32) -> (i32, i32) {
    %c0_i32 = arith.constant 0 : i32
    %c0_i32_0 = arith.constant 0 : i32
    %c0_i32_1 = arith.constant 0 : i32
    return %c0_i32, %c0_i32_0 : i32, i32
  }
  func.func @transform_5(%arg0: i32) -> (i32, i32) {
    %c0_i32 = arith.constant 0 : i32
    %c0_i32_0 = arith.constant 0 : i32
    return %arg0, %c0_i32 : i32, i32
  }
}

</mosaic_0001>

<bundles_post_ra>
// kernel: tpu_custom_call.1
= control target key start
LH: loop header
LB: loop body
LE: loop exit
PB: predicated region body
PF: predicated region fallthrough
CT: control target
= control target key end

     0   :  { %10 = vsyncpa [#allocation3], 0  ;;  %s598_s0 = inlined_call_operand.hbm [shape: f32[8,128], index: 0, kind: input, shape index: {}]   ;;  %s599_s1 = inlined_call_operand.hbm [shape: bf16[128,128], index: 1, kind: input, shape index: {}]   ;;  %s600_s2 = inlined_call_operand.vmem [shape: f32[1,128], index: 2, kind: input, shape index: {}]   ;;  %s601_s3 = inlined_call_operand.hbm [shape: bf16[128,128], index: 3, kind: input, shape index: {}]   ;;  %s602_s4 = inlined_call_operand.vmem [shape: f32[1,128], index: 4, kind: input, shape index: {}]   ;;  %s603_s5 = inlined_call_operand.hbm [shape: f32[8,128], index: 5, kind: output, shape index: {}]  }
   0x1   :  { %11 = vsyncpa [#allocation6], 0 }
   0x2   :  { %12 = vsyncpa [#allocation4], 0  ;;  %s500_s18 = smov [#allocation5]   ;;  %s406_s22 = scalar_lea.hbm %s599_s1, 1024 }
   0x3   :  { %s28_s19 = sshll.u32 %s500_s18, 4  ;;  %p407_p0 = scmp.ne.s32.totalorder %s599_s1, %s406_s22  ;;  %s29_s19 = int_to_ptr.vmem [resolvable:$true] %s28_s19 }
   0x4   :  { %p410_p1 = scmp.lt.u32.totalorder %s406_s22, %s599_s1 }
   0x6   :  { %p412_p2 = pnand %p410_p1, %p407_p0 }
   0x8   :  { %415 = shalt.err (!%p412_p2)
}
   0x9   :  { %s416_s27 = scalar_lea.vmem %s29_s19, 1024  ;;  %p421_p4 = scmp.lt.s32.totalorder %s29_s19, %s29_s19 }
   0xa   :  { %p417_p3 = scmp.ne.s32.totalorder %s29_s19, %s416_s27  ;;  %p422_p5 = scmp.lt.s32.totalorder %s416_s27, %s416_s27 }
   0xc   :  { %p423_p6 = por %p422_p5, %p421_p4 }
   0xe   :  { %p424_p7 = pnand %p423_p6, %p417_p3 }
  0x10   :  { %427 = shalt.err (!%p424_p7)
}
  0x11   :  { %s501_s28 = smov 64   ;;  %s502_s29 = smov 4  }
  0x12   :  { %34 = dma.hbm_to_vmem [thread:$0]  %s599_s1, 1024, %s29_s19, [#allocation6], %s501_s28, %s501_s28, %s502_s29  }
  0x13   :  { %s503_s7 = smov [#allocation2]   ;;  %s504_s9 = smov [#allocation7]  }
  0x14   :  { %s19_s8 = sshll.u32 %s503_s7, 4  ;;  %s42_s10 = sshll.u32 %s504_s9, 4  ;;  %s20_s8 = int_to_ptr.vmem [resolvable:$true] %s19_s8  ;;  %s43_s10 = int_to_ptr.vmem [resolvable:$true] %s42_s10 }
  0x15   :  { %s428_s13 = scalar_lea.hbm %s598_s0, 128 }
  0x16   :  { %p429_p8 = scmp.ne.s32.totalorder %s598_s0, %s428_s13  ;;  %p432_p9 = scmp.lt.u32.totalorder %s428_s13, %s598_s0 }
  0x18   :  { %p434_p10 = pnand %p432_p9, %p429_p8 }
  0x1a   :  { %437 = shalt.err (!%p434_p10)
}
  0x1b   :  { %s438_s1 = scalar_lea.vmem %s20_s8, 128  ;;  %p443_p12 = scmp.lt.s32.totalorder %s20_s8, %s20_s8 }
  0x1c   :  { %p439_p11 = scmp.ne.s32.totalorder %s20_s8, %s438_s1  ;;  %p444_p13 = scmp.lt.s32.totalorder %s438_s1, %s438_s1 }
  0x1e   :  { %p445_p0 = por %p444_p13, %p443_p12 }
  0x20   :  { %p446_p1 = pnand %p445_p0, %p439_p11 }
  0x22   :  { %449 = shalt.err (!%p446_p1)
}
  0x23   :  { %22 = dma.hbm_to_vmem [thread:$0]  %s598_s0, 128, %s20_s8, [#allocation3]  }
  0x24   :  { %s450_s22 = scalar_lea.hbm %s601_s3, 1024 }
  0x25   :  { %p451_p2 = scmp.ne.s32.totalorder %s601_s3, %s450_s22  ;;  %p454_p3 = scmp.lt.u32.totalorder %s450_s22, %s601_s3 }
  0x27   :  { %p456_p4 = pnand %p454_p3, %p451_p2 }
  0x29   :  { %459 = shalt.err (!%p456_p4)
}
  0x2a   :  { %s460_s27 = scalar_lea.vmem %s43_s10, 1024  ;;  %p465_p6 = scmp.lt.s32.totalorder %s43_s10, %s43_s10 }
  0x2b   :  { %p461_p5 = scmp.ne.s32.totalorder %s43_s10, %s460_s27  ;;  %p466_p7 = scmp.lt.s32.totalorder %s460_s27, %s460_s27 }
  0x2d   :  { %p467_p8 = por %p466_p7, %p465_p6 }
  0x2f   :  { %p468_p9 = pnand %p467_p8, %p461_p5 }
  0x31   :  { %471 = shalt.err (!%p468_p9)
}
  0x32   :  { %48 = dma.hbm_to_vmem [thread:$0]  %s601_s3, 1024, %s43_s10, [#allocation6], %s501_s28, %s501_s28, %s502_s29  }
  0x33   :  { %494 = dma.done.wait [#allocation3], 128  }
  0x34   :  { %495 = vsyncadd [#allocation3], 4294967168 }
  0x35   :  { %496 = dma.done.wait [#allocation6], 2048  }
  0x36   :  { %497 = vsyncadd [#allocation6], 4294965248  ;;  %v505_v0 = vmov 0.0   ;;  %vm506_vm0 = vmmov 0   ;;  %v390_v1 = vld [vmem:[#allocation5] sm:$0xff]   ;;  %v391_v2 = vld [vmem:[#allocation5 + $0x8] sm:$0xff]  }
  0x37   :  { %342 = vmatprep.subr.bf16.mxu0 %v505_v0  ;;  %358 = vmatprep.mubr.msk.bf16.mxu0 %vm506_vm0, %v505_v0  ;;  %v392_v3 = vld [vmem:[#allocation5 + $0x10] sm:$0xff]   ;;  %v398_v4 = vld [vmem:[#allocation7] sm:$0xff]   ;;  %v393_v5 = vld [vmem:[#allocation5 + $0x18] sm:$0xff]   ;;  %s507_s7 = smov [#allocation8]  }
  0x38   :  { %362 = vmatprep.subr.bf16.mxu1 %v505_v0  ;;  %378 = vmatprep.mubr.msk.bf16.mxu1 %vm506_vm0, %v505_v0  ;;  %v399_v6 = vld [vmem:[#allocation7 + $0x8] sm:$0xff]   ;;  %v394_v7 = vld [vmem:[#allocation5 + $0x20] sm:$0xff]   ;;  %v400_v8 = vld [vmem:[#allocation7 + $0x10] sm:$0xff]   ;;  %s296_s8 = sshll.u32 %s507_s7, 4  ;;  %s297_s8 = int_to_ptr.vmem [resolvable:$true] %s296_s8 }
  0x39   :  { %343 = vmatpush3.bf16.msra.mxu0 %v390_v1  ;;  %363 = vmatpush3.bf16.msra.mxu1 %v398_v4  ;;  %v395_v9 = vld [vmem:[#allocation5 + $0x28] sm:$0xff]   ;;  %v401_v10 = vld [vmem:[#allocation7 + $0x18] sm:$0xff]   ;;  %v396_v11 = vld [vmem:[#allocation5 + $0x30] sm:$0xff]   ;;  %p477_p11 = scmp.lt.s32.totalorder %s297_s8, %s297_s8 }
  0x3a   :  { %344 = vmatprep.subr.bf16.mxu0 %v505_v0  ;;  %364 = vmatprep.subr.bf16.mxu1 %v505_v0  ;;  %v402_v12 = vld [vmem:[#allocation7 + $0x20] sm:$0xff]   ;;  %v397_v13 = vld [vmem:[#allocation5 + $0x38] sm:$0xff]   ;;  %v403_v15 = vld [vmem:[#allocation7 + $0x28] sm:$0xff]  }
  0x3b   :  { %v61_v14 = vld [vmem:[#allocation2] sm:$0xff]  ;;  %v404_v17 = vld [vmem:[#allocation7 + $0x30] sm:$0xff]  }
  0x3c   :  { %v62_v16 = vpack.c.bf16 %v61_v14, %v61_v14  ;;  %v405_v18 = vld [vmem:[#allocation7 + $0x38] sm:$0xff]  }
  0x3d   :  { %345 = vmatpush3.bf16.msra.mxu0 %v391_v2  ;;  %365 = vmatpush3.bf16.msra.mxu1 %v399_v6  ;;  %v306_v19 = vld [vmem:[%s600_s2] ss:$0 sm:$0xff]  ;;  %s472_s2 = scalar_lea.vmem %s297_s8, 128 }
  0x3e   :  { %346 = vmatprep.subr.bf16.mxu0 %v505_v0  ;;  %366 = vmatprep.subr.bf16.mxu1 %v505_v0  ;;  %v315_v27 = vld [vmem:[%s602_s4] ss:$0 sm:$0xff]  ;;  %p473_p10 = scmp.ne.s32.totalorder %s297_s8, %s472_s2  ;;  %p478_p12 = scmp.lt.s32.totalorder %s472_s2, %s472_s2 }
  0x40   :  { %p479_p13 = por %p478_p12, %p477_p11 }
  0x41   :  { %347 = vmatpush3.bf16.msra.mxu0 %v392_v3  ;;  %367 = vmatpush3.bf16.msra.mxu1 %v400_v8 }
  0x42   :  { %348 = vmatprep.subr.bf16.mxu0 %v505_v0  ;;  %368 = vmatprep.subr.bf16.mxu1 %v505_v0  ;;  %p480_p0 = pnand %p479_p13, %p473_p10 }
  0x45   :  { %349 = vmatpush3.bf16.msra.mxu0 %v393_v5  ;;  %369 = vmatpush3.bf16.msra.mxu1 %v401_v10 }
  0x46   :  { %350 = vmatprep.subr.bf16.mxu0 %v505_v0  ;;  %370 = vmatprep.subr.bf16.mxu1 %v505_v0 }
  0x49   :  { %351 = vmatpush3.bf16.msra.mxu0 %v394_v7  ;;  %371 = vmatpush3.bf16.msra.mxu1 %v402_v12 }
  0x4a   :  { %352 = vmatprep.subr.bf16.mxu0 %v505_v0  ;;  %372 = vmatprep.subr.bf16.mxu1 %v505_v0 }
  0x4d   :  { %353 = vmatpush3.bf16.msra.mxu0 %v395_v9  ;;  %373 = vmatpush3.bf16.msra.mxu1 %v403_v15 }
  0x4e   :  { %354 = vmatprep.subr.bf16.mxu0 %v505_v0  ;;  %374 = vmatprep.subr.bf16.mxu1 %v505_v0 }
  0x51   :  { %355 = vmatpush3.bf16.msra.mxu0 %v396_v11  ;;  %375 = vmatpush3.bf16.msra.mxu1 %v404_v17 }
  0x52   :  { %356 = vmatprep.subr.bf16.mxu0 %v505_v0  ;;  %376 = vmatprep.subr.bf16.mxu1 %v505_v0 }
  0x55   :  { %357 = vmatpush3.bf16.msra.mxu0 %v397_v13  ;;  %377 = vmatpush3.bf16.msra.mxu1 %v405_v18 }
  0x58   :  { %359 = vmatmul.mubr.bf16.vlgmr.msra.gmra.mrb[0].mxu0 %v62_v16 }
 0x12b   :  { %v168_v20 = vpop.f32.mrb[0].mxu0 }
 0x12c   :  { %v169_v21 = vadd.f32 %v306_v19, %v168_v20  ;;  %v360_v22 = vpop.f32.mrb[1].mxu0 }
 0x12d   :  { %v171_v23 = vpop.f32.mrb[2].mxu0 }
 0x12e   :  { %v174_v24 = vmax.f32 %v169_v21, 0.0  ;;  %v361_v25 = vpop.f32.mrb[3].mxu0 }
 0x130   :  { %v175_v26 = vpack.c.bf16 %v174_v24, %v174_v24 }
 0x132   :  { %379 = vmatmul.mubr.bf16.vlgmr.msra.gmra.mrb[0].mxu1 %v175_v26 }
 0x205   :  { %v281_v28 = vpop.f32.mrb[0].mxu1 }
 0x206   :  { %v282_v29 = vadd.f32 %v315_v27, %v281_v28  ;;  %v380_v30 = vpop.f32.mrb[1].mxu1 }
 0x207   :  { %v284_v31 = vpop.f32.mrb[2].mxu1 }
 0x208   :  { %v287_v32 = vmax.f32 %v282_v29, 0.0  ;;  %v381_v33 = vpop.f32.mrb[3].mxu1 }
 0x20a   :  { %v288_v34 = vadd.f32 %v287_v32, %v61_v14 }
 0x20c   :  { %289 = vst [vmem:[#allocation8] sm:$0xff] %v288_v34 }
 0x20d   :  { %483 = shalt.err (!%p480_p0)
}
 0x20e   :  { %s484_s10 = scalar_lea.hbm %s603_s5, 128 }
 0x20f   :  { %p485_p1 = scmp.ne.s32.totalorder %s603_s5, %s484_s10  ;;  %p488_p2 = scmp.lt.u32.totalorder %s484_s10, %s603_s5 }
 0x211   :  { %p490_p3 = pnand %p488_p2, %p485_p1 }
 0x213   :  { %493 = shalt.err (!%p490_p3)
}
 0x214   :  { %299 = dma.vmem_to_hbm [thread:$0]  %s297_s8, 128, %s603_s5, [#allocation4]  }
 0x215   :  { %498 = dma.done.wait [#allocation4], 128  }
 0x216   :  { %499 = vsyncadd [#allocation4], 4294967168 }
 0x217   :  { %303 = vsyncpa [#allocation3], 1 }
 0x218   :  { %304 = vsyncpa [#allocation6], 1 }
 0x219   :  { %305 = vsyncpa [#allocation4], 1 }

// kernel: tpu_custom_call.1
= control target key start
LH: loop header
LB: loop body
LE: loop exit
PB: predicated region body
PF: predicated region fallthrough
CT: control target
= control target key end

     0   :  { %10 = vsyncpa [#allocation3], 0  ;;  %s598_s0 = inlined_call_operand.hbm [shape: f32[8,128], index: 0, kind: input, shape index: {}]   ;;  %s599_s1 = inlined_call_operand.hbm [shape: bf16[128,128], index: 1, kind: input, shape index: {}]   ;;  %s600_s2 = inlined_call_operand.vmem [shape: f32[1,128], index: 2, kind: input, shape index: {}]   ;;  %s601_s3 = inlined_call_operand.hbm [shape: bf16[128,128], index: 3, kind: input, shape index: {}]   ;;  %s602_s4 = inlined_call_operand.vmem [shape: f32[1,128], index: 4, kind: input, shape index: {}]   ;;  %s603_s5 = inlined_call_operand.hbm [shape: f32[8,128], index: 5, kind: output, shape index: {}]  }
   0x1   :  { %11 = vsyncpa [#allocation6], 0 }
   0x2   :  { %12 = vsyncpa [#allocation4], 0  ;;  %s500_s18 = smov [#allocation5]   ;;  %s406_s22 = scalar_lea.hbm %s599_s1, 1024 }
   0x3   :  { %s28_s19 = sshll.u32 %s500_s18, 4  ;;  %p407_p0 = scmp.ne.s32.totalorder %s599_s1, %s406_s22  ;;  %s29_s19 = int_to_ptr.vmem [resolvable:$true] %s28_s19 }
   0x4   :  { %p410_p1 = scmp.lt.u32.totalorder %s406_s22, %s599_s1 }
   0x6   :  { %p412_p2 = pnand %p410_p1, %p407_p0 }
   0x8   :  { %415 = shalt.err (!%p412_p2)
}
   0x9   :  { %s416_s27 = scalar_lea.vmem %s29_s19, 1024  ;;  %p421_p4 = scmp.lt.s32.totalorder %s29_s19, %s29_s19 }
   0xa   :  { %p417_p3 = scmp.ne.s32.totalorder %s29_s19, %s416_s27  ;;  %p422_p5 = scmp.lt.s32.totalorder %s416_s27, %s416_s27 }
   0xc   :  { %p423_p6 = por %p422_p5, %p421_p4 }
   0xe   :  { %p424_p7 = pnand %p423_p6, %p417_p3 }
  0x10   :  { %427 = shalt.err (!%p424_p7)
}
  0x11   :  { %s501_s28 = smov 64   ;;  %s502_s29 = smov 4  }
  0x12   :  { %34 = dma.hbm_to_vmem [thread:$0]  %s599_s1, 1024, %s29_s19, [#allocation6], %s501_s28, %s501_s28, %s502_s29  }
  0x13   :  { %s503_s7 = smov [#allocation2]   ;;  %s504_s9 = smov [#allocation7]  }
  0x14   :  { %s19_s8 = sshll.u32 %s503_s7, 4  ;;  %s42_s10 = sshll.u32 %s504_s9, 4  ;;  %s20_s8 = int_to_ptr.vmem [resolvable:$true] %s19_s8  ;;  %s43_s10 = int_to_ptr.vmem [resolvable:$true] %s42_s10 }
  0x15   :  { %s428_s13 = scalar_lea.hbm %s598_s0, 128 }
  0x16   :  { %p429_p8 = scmp.ne.s32.totalorder %s598_s0, %s428_s13  ;;  %p432_p9 = scmp.lt.u32.totalorder %s428_s13, %s598_s0 }
  0x18   :  { %p434_p10 = pnand %p432_p9, %p429_p8 }
  0x1a   :  { %437 = shalt.err (!%p434_p10)
}
  0x1b   :  { %s438_s1 = scalar_lea.vmem %s20_s8, 128  ;;  %p443_p12 = scmp.lt.s32.totalorder %s20_s8, %s20_s8 }
  0x1c   :  { %p439_p11 = scmp.ne.s32.totalorder %s20_s8, %s438_s1  ;;  %p444_p13 = scmp.lt.s32.totalorder %s438_s1, %s438_s1 }
  0x1e   :  { %p445_p0 = por %p444_p13, %p443_p12 }
  0x20   :  { %p446_p1 = pnand %p445_p0, %p439_p11 }
  0x22   :  { %449 = shalt.err (!%p446_p1)
}
  0x23   :  { %22 = dma.hbm_to_vmem [thread:$0]  %s598_s0, 128, %s20_s8, [#allocation3]  }
  0x24   :  { %s450_s22 = scalar_lea.hbm %s601_s3, 1024 }
  0x25   :  { %p451_p2 = scmp.ne.s32.totalorder %s601_s3, %s450_s22  ;;  %p454_p3 = scmp.lt.u32.totalorder %s450_s22, %s601_s3 }
  0x27   :  { %p456_p4 = pnand %p454_p3, %p451_p2 }
  0x29   :  { %459 = shalt.err (!%p456_p4)
}
  0x2a   :  { %s460_s27 = scalar_lea.vmem %s43_s10, 1024  ;;  %p465_p6 = scmp.lt.s32.totalorder %s43_s10, %s43_s10 }
  0x2b   :  { %p461_p5 = scmp.ne.s32.totalorder %s43_s10, %s460_s27  ;;  %p466_p7 = scmp.lt.s32.totalorder %s460_s27, %s460_s27 }
  0x2d   :  { %p467_p8 = por %p466_p7, %p465_p6 }
  0x2f   :  { %p468_p9 = pnand %p467_p8, %p461_p5 }
  0x31   :  { %471 = shalt.err (!%p468_p9)
}
  0x32   :  { %48 = dma.hbm_to_vmem [thread:$0]  %s601_s3, 1024, %s43_s10, [#allocation6], %s501_s28, %s501_s28, %s502_s29  }
  0x33   :  { %494 = dma.done.wait [#allocation3], 128  }
  0x34   :  { %495 = vsyncadd [#allocation3], 4294967168 }
  0x35   :  { %496 = dma.done.wait [#allocation6], 2048  }
  0x36   :  { %497 = vsyncadd [#allocation6], 4294965248  ;;  %v505_v0 = vmov 0.0   ;;  %vm506_vm0 = vmmov 0   ;;  %v390_v1 = vld [vmem:[#allocation5] sm:$0xff]   ;;  %v391_v2 = vld [vmem:[#allocation5 + $0x8] sm:$0xff]  }
  0x37   :  { %342 = vmatprep.subr.bf16.mxu0 %v505_v0  ;;  %358 = vmatprep.mubr.msk.bf16.mxu0 %vm506_vm0, %v505_v0  ;;  %v392_v3 = vld [vmem:[#allocation5 + $0x10] sm:$0xff]   ;;  %v398_v4 = vld [vmem:[#allocation7] sm:$0xff]   ;;  %v393_v5 = vld [vmem:[#allocation5 + $0x18] sm:$0xff]   ;;  %s507_s7 = smov [#allocation8]  }
  0x38   :  { %362 = vmatprep.subr.bf16.mxu1 %v505_v0  ;;  %378 = vmatprep.mubr.msk.bf16.mxu1 %vm506_vm0, %v505_v0  ;;  %v399_v6 = vld [vmem:[#allocation7 + $0x8] sm:$0xff]   ;;  %v394_v7 = vld [vmem:[#allocation5 + $0x20] sm:$0xff]   ;;  %v400_v8 = vld [vmem:[#allocation7 + $0x10] sm:$0xff]   ;;  %s296_s8 = sshll.u32 %s507_s7, 4  ;;  %s297_s8 = int_to_ptr.vmem [resolvable:$true] %s296_s8 }
  0x39   :  { %343 = vmatpush3.bf16.msra.mxu0 %v390_v1  ;;  %363 = vmatpush3.bf16.msra.mxu1 %v398_v4  ;;  %v395_v9 = vld [vmem:[#allocation5 + $0x28] sm:$0xff]   ;;  %v401_v10 = vld [vmem:[#allocation7 + $0x18] sm:$0xff]   ;;  %v396_v11 = vld [vmem:[#allocation5 + $0x30] sm:$0xff]   ;;  %p477_p11 = scmp.lt.s32.totalorder %s297_s8, %s297_s8 }
  0x3a   :  { %344 = vmatprep.subr.bf16.mxu0 %v505_v0  ;;  %364 = vmatprep.subr.bf16.mxu1 %v505_v0  ;;  %v402_v12 = vld [vmem:[#allocation7 + $0x20] sm:$0xff]   ;;  %v397_v13 = vld [vmem:[#allocation5 + $0x38] sm:$0xff]   ;;  %v403_v15 = vld [vmem:[#allocation7 + $0x28] sm:$0xff]  }
  0x3b   :  { %v61_v14 = vld [vmem:[#allocation2] sm:$0xff]  ;;  %v404_v17 = vld [vmem:[#allocation7 + $0x30] sm:$0xff]  }
  0x3c   :  { %v62_v16 = vpack.c.bf16 %v61_v14, %v61_v14  ;;  %v405_v18 = vld [vmem:[#allocation7 + $0x38] sm:$0xff]  }
  0x3d   :  { %345 = vmatpush3.bf16.msra.mxu0 %v391_v2  ;;  %365 = vmatpush3.bf16.msra.mxu1 %v399_v6  ;;  %v306_v19 = vld [vmem:[%s600_s2] ss:$0 sm:$0xff]  ;;  %s472_s2 = scalar_lea.vmem %s297_s8, 128 }
  0x3e   :  { %346 = vmatprep.subr.bf16.mxu0 %v505_v0  ;;  %366 = vmatprep.subr.bf16.mxu1 %v505_v0  ;;  %v315_v27 = vld [vmem:[%s602_s4] ss:$0 sm:$0xff]  ;;  %p473_p10 = scmp.ne.s32.totalorder %s297_s8, %s472_s2  ;;  %p478_p12 = scmp.lt.s32.totalorder %s472_s2, %s472_s2 }
  0x40   :  { %p479_p13 = por %p478_p12, %p477_p11 }
  0x41   :  { %347 = vmatpush3.bf16.msra.mxu0 %v392_v3  ;;  %367 = vmatpush3.bf16.msra.mxu1 %v400_v8 }
  0x42   :  { %348 = vmatprep.subr.bf16.mxu0 %v505_v0  ;;  %368 = vmatprep.subr.bf16.mxu1 %v505_v0  ;;  %p480_p0 = pnand %p479_p13, %p473_p10 }
  0x45   :  { %349 = vmatpush3.bf16.msra.mxu0 %v393_v5  ;;  %369 = vmatpush3.bf16.msra.mxu1 %v401_v10 }
  0x46   :  { %350 = vmatprep.subr.bf16.mxu0 %v505_v0  ;;  %370 = vmatprep.subr.bf16.mxu1 %v505_v0 }
  0x49   :  { %351 = vmatpush3.bf16.msra.mxu0 %v394_v7  ;;  %371 = vmatpush3.bf16.msra.mxu1 %v402_v12 }
  0x4a   :  { %352 = vmatprep.subr.bf16.mxu0 %v505_v0  ;;  %372 = vmatprep.subr.bf16.mxu1 %v505_v0 }
  0x4d   :  { %353 = vmatpush3.bf16.msra.mxu0 %v395_v9  ;;  %373 = vmatpush3.bf16.msra.mxu1 %v403_v15 }
  0x4e   :  { %354 = vmatprep.subr.bf16.mxu0 %v505_v0  ;;  %374 = vmatprep.subr.bf16.mxu1 %v505_v0 }
  0x51   :  { %355 = vmatpush3.bf16.msra.mxu0 %v396_v11  ;;  %375 = vmatpush3.bf16.msra.mxu1 %v404_v17 }
  0x52   :  { %356 = vmatprep.subr.bf16.mxu0 %v505_v0  ;;  %376 = vmatprep.subr.bf16.mxu1 %v505_v0 }
  0x55   :  { %357 = vmatpush3.bf16.msra.mxu0 %v397_v13  ;;  %377 = vmatpush3.bf16.msra.mxu1 %v405_v18 }
  0x58   :  { %359 = vmatmul.mubr.bf16.vlgmr.msra.gmra.mrb[0].mxu0 %v62_v16 }
 0x12b   :  { %v168_v20 = vpop.f32.mrb[0].mxu0 }
 0x12c   :  { %v169_v21 = vadd.f32 %v306_v19, %v168_v20  ;;  %v360_v22 = vpop.f32.mrb[1].mxu0 }
 0x12d   :  { %v171_v23 = vpop.f32.mrb[2].mxu0 }
 0x12e   :  { %v174_v24 = vmax.f32 %v169_v21, 0.0  ;;  %v361_v25 = vpop.f32.mrb[3].mxu0 }
 0x130   :  { %v175_v26 = vpack.c.bf16 %v174_v24, %v174_v24 }
 0x132   :  { %379 = vmatmul.mubr.bf16.vlgmr.msra.gmra.mrb[0].mxu1 %v175_v26 }
 0x205   :  { %v281_v28 = vpop.f32.mrb[0].mxu1 }
 0x206   :  { %v282_v29 = vadd.f32 %v315_v27, %v281_v28  ;;  %v380_v30 = vpop.f32.mrb[1].mxu1 }
 0x207   :  { %v284_v31 = vpop.f32.mrb[2].mxu1 }
 0x208   :  { %v287_v32 = vmax.f32 %v282_v29, 0.0  ;;  %v381_v33 = vpop.f32.mrb[3].mxu1 }
 0x20a   :  { %v288_v34 = vadd.f32 %v287_v32, %v61_v14 }
 0x20c   :  { %289 = vst [vmem:[#allocation8] sm:$0xff] %v288_v34 }
 0x20d   :  { %483 = shalt.err (!%p480_p0)
}
 0x20e   :  { %s484_s10 = scalar_lea.hbm %s603_s5, 128 }
 0x20f   :  { %p485_p1 = scmp.ne.s32.totalorder %s603_s5, %s484_s10  ;;  %p488_p2 = scmp.lt.u32.totalorder %s484_s10, %s603_s5 }
 0x211   :  { %p490_p3 = pnand %p488_p2, %p485_p1 }
 0x213   :  { %493 = shalt.err (!%p490_p3)
}
 0x214   :  { %299 = dma.vmem_to_hbm [thread:$0]  %s297_s8, 128, %s603_s5, [#allocation4]  }
 0x215   :  { %498 = dma.done.wait [#allocation4], 128  }
 0x216   :  { %499 = vsyncadd [#allocation4], 4294967168 }
 0x217   :  { %303 = vsyncpa [#allocation3], 1 }
 0x218   :  { %304 = vsyncpa [#allocation6], 1 }
 0x219   :  { %305 = vsyncpa [#allocation4], 1 }

</bundles_post_ra>
